<compile_context>
chip_gen: v5e
topology: v5e:2x2
jax: 0.10.0
libtpu: 0.0.40
codegen_flags: <defaults>
</compile_context>

<pallas_src>
import functools

import jax
import jax.numpy as jnp
import numpy as np
from jax.experimental import pallas as pl
from jax.experimental.pallas import tpu as pltpu


# ------------------------------- Pallas kernel -------------------------------
def _embed_fc_kernel(x_ref, w1_ref, b1_ref, w2_ref, b2_ref, o_ref):
    # x  : (tm, Din)  streamed, native dtype (bf16 preferred)
    # w1 : (Din, H) bf16    b1 : (1, H) f32
    # w2 : (H,  H)  bf16    b2 : (1, H) f32
    # o  : (tm, H)  same dtype as x (by default)
    x = x_ref[...]

    # Linear 1: bf16 MXU operands, f32 accumulation.
    h = jnp.dot(x.astype(jnp.bfloat16), w1_ref[...],
                preferred_element_type=jnp.float32)
    h = h + b1_ref[...]

    # GELU (tanh approximation), all elementwise math in f32.
    # TODO(synk): nn.GELU() defaults to the exact erf form; the tanh
    #             approximation (~1e-3 deviation) is used for a guaranteed
    #             Mosaic lowering (tanh rides the EUP slot for free).
    c = jnp.float32(0.7978845608028654)  # sqrt(2/pi)
    h = 0.5 * h * (1.0 + jnp.tanh(c * (h + 0.044715 * (h * h * h))))

    # Linear 2: bf16 MXU operands, f32 accumulation.
    out = jnp.dot(h.astype(jnp.bfloat16), w2_ref[...],
                  preferred_element_type=jnp.float32)
    o_ref[...] = (out + b2_ref[...]).astype(o_ref.dtype)


# --------------------------------- wrapper -----------------------------------
def embed_fc_forward(x, params, *, block_rows=None, out_dtype=None):
    """EmbedFC.forward(x): view(-1, input_dim) -> Linear -> GELU -> Linear."""
    w1, b1, w2, b2 = params
    input_dim, emb_dim = w1.shape

    # Weights as bf16 MXU operands (no-op if already bf16); biases in f32.
    w1 = w1.astype(jnp.bfloat16)
    w2 = w2.astype(jnp.bfloat16)
    b1 = b1.reshape(1, emb_dim).astype(jnp.float32)
    b2 = b2.reshape(1, emb_dim).astype(jnp.float32)

    # Stream x in its native dtype (bf16 halves the dominant HBM stream); the
    # kernel casts at the dot boundary, so an f32 caller pays no extra pass.
    x2 = x.reshape(-1, input_dim)
    n = x2.shape[0]
    if out_dtype is None:
        out_dtype = x2.dtype
    x_bytes = np.dtype(x2.dtype).itemsize
    o_bytes = np.dtype(out_dtype).itemsize

    # Generation-aware VMEM ceiling (v5e/v6e: 128 MiB, v7x: 64 MiB per TC).
    try:
        vmem_cap = int(pltpu.get_tpu_info().vmem_capacity_bytes)
    except Exception:  # conservative fallback (v7x per-TC size)
        vmem_cap = 64 << 20
    vmem_ceiling = int(vmem_cap * 0.85)

    # single-buffered resident operands + double-buffered x/out tiles
    # + f32 intermediates materialized inside the kernel body.
    weight_bytes = w1.size * 2 + w2.size * 2 + (b1.size + b2.size) * 4

    def vmem_need(tm):
        act = 2 * (tm * input_dim * x_bytes + tm * emb_dim * o_bytes)
        body = tm * input_dim * 4 + tm * emb_dim * 4
        return act + weight_bytes + body

    # Row tile: mem-bound streaming kernel -> large tiles to amortize the
    # per-grid-step overhead; shrink only if VMEM demands it.  The 512/1024
    # cap keeps grid >= 2 on big batches so v7x's two TCs both get work.
    if block_rows is None:
        block_rows = 1024 if emb_dim <= 512 else 512
    tm = block_rows
    while tm > 64 and vmem_need(tm) > vmem_ceiling:
        tm //= 2

    if n <= tm:
        tm = n              # single block; block dim == full array dim is legal
        grid = (1,)
    else:
        # No padding: Pallas handles the ragged last block (OOB reads give
        # garbage rows whose writes are dropped; compute is row-independent).
        grid = (pl.cdiv(n, tm),)

    vmem_bytes = min(max(vmem_need(tm) + (4 << 20), 16 << 20), vmem_ceiling)

    flops = 2 * n * emb_dim * (input_dim + emb_dim)
    bytes_accessed = n * input_dim * x_bytes + n * emb_dim * o_bytes + weight_bytes

    # Resident operands (constant index_map) -> single-buffered, no re-fetch.
    resident = functools.partial(pl.BlockSpec, pipeline_mode=pl.Buffered(1))

    out = pl.pallas_call(
        _embed_fc_kernel,
        out_shape=jax.ShapeDtypeStruct((n, emb_dim), out_dtype),
        grid_spec=pltpu.PrefetchScalarGridSpec(
            num_scalar_prefetch=0,
            grid=grid,
            in_specs=[
                pl.BlockSpec((tm, input_dim), lambda i: (i, 0)),    # x (streamed)
                resident((input_dim, emb_dim), lambda i: (0, 0)),   # w1 (resident)
                resident((1, emb_dim), lambda i: (0, 0)),           # b1 (resident)
                resident((emb_dim, emb_dim), lambda i: (0, 0)),     # w2 (resident)
                resident((1, emb_dim), lambda i: (0, 0)),           # b2 (resident)
            ],
            out_specs=pl.BlockSpec((tm, emb_dim), lambda i: (i, 0)),
        ),
        compiler_params=pltpu.CompilerParams(
            dimension_semantics=("parallel",),   # shard rows across v7x's 2 TCs
            vmem_limit_bytes=int(vmem_bytes),
        ),
        cost_estimate=pl.CostEstimate(
            flops=int(flops),
            transcendentals=int(n * emb_dim),
            bytes_accessed=int(bytes_accessed),
        ),
    )(x2, w1, b1, w2, b2)

    return out


# pure-JAX reference (mirrors the kernel's bf16-operand / f32-accumulate casts)
def _reference(x, params, out_dtype):
    w1, b1, w2, b2 = params
    x2 = x.reshape(-1, w1.shape[0])
    h = jnp.dot(x2.astype(jnp.bfloat16), w1.astype(jnp.bfloat16),
                preferred_element_type=jnp.float32)
    h = h + b1.reshape(1, -1).astype(jnp.float32)
    c = jnp.float32(0.7978845608028654)
    h = 0.5 * h * (1.0 + jnp.tanh(c * (h + 0.044715 * (h * h * h))))
    out = jnp.dot(h.astype(jnp.bfloat16), w2.astype(jnp.bfloat16),
                  preferred_element_type=jnp.float32)
    out = out + b2.reshape(1, -1).astype(jnp.float32)
    return out.astype(out_dtype)


if __name__ == "__main__":
    # Small shapes consistent with EmbedFC: x views to (-1, input_dim).
    batch, seq = 2, 8
    input_dim, emb_dim = 128, 128

    key = jax.random.PRNGKey(0)
    kx, kw1, kb1, kw2, kb2 = jax.random.split(key, 5)

    # bf16 activations + weights (the optimized streaming path); biases f32.
    x = jax.random.normal(kx, (batch, seq, input_dim),
                          dtype=jnp.float32).astype(jnp.bfloat16)
    w1 = (jax.random.normal(kw1, (input_dim, emb_dim), dtype=jnp.float32)
          * (1.0 / np.sqrt(input_dim))).astype(jnp.bfloat16)
    b1 = jax.random.normal(kb1, (1, emb_dim), dtype=jnp.float32) * 0.02
    w2 = (jax.random.normal(kw2, (emb_dim, emb_dim), dtype=jnp.float32)
          * (1.0 / np.sqrt(emb_dim))).astype(jnp.bfloat16)
    b2 = jax.random.normal(kb2, (1, emb_dim), dtype=jnp.float32) * 0.02
    params = (w1, b1, w2, b2)

    # Note: at 16 rows this shape is far below the size where the Pallas path
    # pays off (fixed launch + per-step overhead dominate); it is only a
    # correctness check, not a benchmark shape.
    out = jax.block_until_ready(embed_fc_forward(x, params))
    ref = jax.block_until_ready(_reference(x, params, out.dtype))
    np.testing.assert_allclose(np.asarray(out, dtype=np.float32),
                               np.asarray(ref, dtype=np.float32),
                               rtol=2e-2, atol=2e-2)

    # Also exercise the pad-free multi-step grid with a ragged last block
    # (18 rows, 8-row tiles -> grid of 3 with a partial final block).
    x_ragged = jax.random.normal(kx, (2, 9, input_dim),
                                 dtype=jnp.float32).astype(jnp.bfloat16)
    out_r = jax.block_until_ready(embed_fc_forward(x_ragged, params, block_rows=8))
    ref_r = jax.block_until_ready(_reference(x_ragged, params, out_r.dtype))
    np.testing.assert_allclose(np.asarray(out_r, dtype=np.float32),
                               np.asarray(ref_r, dtype=np.float32),
                               rtol=2e-2, atol=2e-2)

    print("KERNEL_OK")
</pallas_src>

<mosaic_0001>
module attributes {stable_mosaic.version = 11 : i64} {
  func.func @_embed_fc_kernel(%arg0: i32, %arg1: memref<16x128xbf16, #tpu.memory_space<vmem>>, %arg2: memref<128x128xbf16, #tpu.memory_space<vmem>>, %arg3: memref<1x128xf32, #tpu.memory_space<vmem>>, %arg4: memref<128x128xbf16, #tpu.memory_space<vmem>>, %arg5: memref<1x128xf32, #tpu.memory_space<vmem>>, %arg6: memref<16x128xbf16, #tpu.memory_space<vmem>>) attributes {dimension_semantics = [#tpu.dimension_semantics<parallel>], iteration_bounds = array<i64: 1>, scalar_prefetch = 0 : i64, scratch_operands = 0 : i64, tpu.core_type = #tpu.core_type<tc>, window_params = [{transform_indices = @transform_0, window_bounds = array<i64: 16, 128>}, {pipeline_mode = #tpu.pipeline_mode<synchronous>, transform_indices = @transform_1, window_bounds = array<i64: 128, 128>}, {pipeline_mode = #tpu.pipeline_mode<synchronous>, transform_indices = @transform_2, window_bounds = array<i64: 1, 128>}, {pipeline_mode = #tpu.pipeline_mode<synchronous>, transform_indices = @transform_3, window_bounds = array<i64: 128, 128>}, {pipeline_mode = #tpu.pipeline_mode<synchronous>, transform_indices = @transform_4, window_bounds = array<i64: 1, 128>}, {transform_indices = @transform_5, window_bounds = array<i64: 16, 128>}]} {
    %c0 = arith.constant 0 : index
    %c0_0 = arith.constant 0 : index
    %0 = vector.load %arg1[%c0, %c0_0] : memref<16x128xbf16, #tpu.memory_space<vmem>>, vector<16x128xbf16>
    %c0_1 = arith.constant 0 : index
    %c0_2 = arith.constant 0 : index
    %1 = vector.load %arg2[%c0_1, %c0_2] : memref<128x128xbf16, #tpu.memory_space<vmem>>, vector<128x128xbf16>
    %cst = arith.constant dense<0.000000e+00> : vector<16x128xf32>
    %2 = tpu.matmul %0, %1, %cst {dimension_numbers = #tpu.dot_dimension_numbers<[1], [0], [0], [1], [0, 0, 1, 1], [], []>} : vector<16x128xbf16>, vector<128x128xbf16>, vector<16x128xf32> -> vector<16x128xf32>
    %c0_3 = arith.constant 0 : index
    %c0_4 = arith.constant 0 : index
    %3 = vector.load %arg3[%c0_3, %c0_4] : memref<1x128xf32, #tpu.memory_space<vmem>>, vector<1x128xf32>
    %4 = vector.broadcast %3 : vector<1x128xf32> to vector<16x128xf32>
    %5 = arith.addf %2, %4 : vector<16x128xf32>
    %cst_5 = arith.constant 5.000000e-01 : f32
    %6 = vector.broadcast %cst_5 : f32 to vector<16x128xf32>
    %7 = arith.mulf %6, %5 : vector<16x128xf32>
    %8 = arith.mulf %5, %5 : vector<16x128xf32>
    %9 = arith.mulf %8, %5 : vector<16x128xf32>
    %cst_6 = arith.constant 4.471500e-02 : f32
    %10 = vector.broadcast %cst_6 : f32 to vector<16x128xf32>
    %11 = arith.mulf %10, %9 : vector<16x128xf32>
    %12 = arith.addf %5, %11 : vector<16x128xf32>
    %cst_7 = arith.constant 0.797884583 : f32
    %13 = vector.broadcast %cst_7 : f32 to vector<16x128xf32>
    %14 = arith.mulf %13, %12 : vector<16x128xf32>
    %15 = math.tanh %14 : vector<16x128xf32>
    %cst_8 = arith.constant 1.000000e+00 : f32
    %16 = vector.broadcast %cst_8 : f32 to vector<16x128xf32>
    %17 = arith.addf %16, %15 : vector<16x128xf32>
    %18 = arith.mulf %7, %17 : vector<16x128xf32>
    %19 = arith.truncf %18 : vector<16x128xf32> to vector<16x128xbf16>
    %c0_9 = arith.constant 0 : index
    %c0_10 = arith.constant 0 : index
    %20 = vector.load %arg4[%c0_9, %c0_10] : memref<128x128xbf16, #tpu.memory_space<vmem>>, vector<128x128xbf16>
    %cst_11 = arith.constant dense<0.000000e+00> : vector<16x128xf32>
    %21 = tpu.matmul %19, %20, %cst_11 {dimension_numbers = #tpu.dot_dimension_numbers<[1], [0], [0], [1], [0, 0, 1, 1], [], []>} : vector<16x128xbf16>, vector<128x128xbf16>, vector<16x128xf32> -> vector<16x128xf32>
    %c0_12 = arith.constant 0 : index
    %c0_13 = arith.constant 0 : index
    %22 = vector.load %arg5[%c0_12, %c0_13] : memref<1x128xf32, #tpu.memory_space<vmem>>, vector<1x128xf32>
    %23 = vector.broadcast %22 : vector<1x128xf32> to vector<16x128xf32>
    %24 = arith.addf %21, %23 : vector<16x128xf32>
    %25 = arith.truncf %24 : vector<16x128xf32> to vector<16x128xbf16>
    %c0_14 = arith.constant 0 : index
    %c0_15 = arith.constant 0 : index
    %26 = vector.load %arg6[%c0_14, %c0_15] : memref<16x128xbf16, #tpu.memory_space<vmem>>, vector<16x128xbf16>
    tpu.vector_store %arg6[%c0_14, %c0_15], %25 {strides = array<i32>} : memref<16x128xbf16, #tpu.memory_space<vmem>>, vector<16x128xbf16>,
    return
  }
  func.func @transform_0(%arg0: i32) -> (i32, i32) {
    %c0_i32 = arith.constant 0 : i32
    %c0_i32_0 = arith.constant 0 : i32
    return %arg0, %c0_i32 : i32, i32
  }
  func.func @transform_1(%arg0: i32) -> (i32, i32) {
    %c0_i32 = arith.constant 0 : i32
    %c0_i32_0 = arith.constant 0 : i32
    %c0_i32_1 = arith.constant 0 : i32
    return %c0_i32, %c0_i32_0 : i32, i32
  }
  func.func @transform_2(%arg0: i32) -> (i32, i32) {
    %c0_i32 = arith.constant 0 : i32
    %c0_i32_0 = arith.constant 0 : i32
    %c0_i32_1 = arith.constant 0 : i32
    return %c0_i32, %c0_i32_0 : i32, i32
  }
  func.func @transform_3(%arg0: i32) -> (i32, i32) {
    %c0_i32 = arith.constant 0 : i32
    %c0_i32_0 = arith.constant 0 : i32
    %c0_i32_1 = arith.constant 0 : i32
    return %c0_i32, %c0_i32_0 : i32, i32
  }
  func.func @transform_4(%arg0: i32) -> (i32, i32) {
    %c0_i32 = arith.constant 0 : i32
    %c0_i32_0 = arith.constant 0 : i32
    %c0_i32_1 = arith.constant 0 : i32
    return %c0_i32, %c0_i32_0 : i32, i32
  }
  func.func @transform_5(%arg0: i32) -> (i32, i32) {
    %c0_i32 = arith.constant 0 : i32
    %c0_i32_0 = arith.constant 0 : i32
    return %arg0, %c0_i32 : i32, i32
  }
}

</mosaic_0001>

<bundles_post_ra>
// kernel: tpu_custom_call.1
= control target key start
LH: loop header
LB: loop body
LE: loop exit
PB: predicated region body
PF: predicated region fallthrough
CT: control target
= control target key end

     0   :  { %10 = vsyncpa [#allocation3], 0  ;;  %s553_s0 = inlined_call_operand.hbm [shape: bf16[16,128], index: 0, kind: input, shape index: {}]   ;;  %s554_s1 = inlined_call_operand.hbm [shape: bf16[128,128], index: 1, kind: input, shape index: {}]   ;;  %s555_s2 = inlined_call_operand.vmem [shape: f32[1,128], index: 2, kind: input, shape index: {}]   ;;  %s556_s3 = inlined_call_operand.hbm [shape: bf16[128,128], index: 3, kind: input, shape index: {}]   ;;  %s557_s4 = inlined_call_operand.vmem [shape: f32[1,128], index: 4, kind: input, shape index: {}]   ;;  %s558_s5 = inlined_call_operand.hbm [shape: bf16[16,128], index: 5, kind: output, shape index: {}]  }
   0x1   :  { %11 = vsyncpa [#allocation6], 0 }
   0x2   :  { %12 = vsyncpa [#allocation4], 0  ;;  %s30_s20 = sshll.u32 %s554_s1, 4  ;;  %s487_s21 = smov [#allocation5]   ;;  %s31_s20 = int_to_ptr.hbm [resolvable:$true] %s30_s20 }
   0x3   :  { %s32_s22 = sshll.u32 %s487_s21, 4  ;;  %s17_s25 = sshll.u32 %s553_s0, 4  ;;  %s33_s22 = int_to_ptr.vmem [resolvable:$true] %s32_s22  ;;  %s18_s25 = int_to_ptr.hbm [resolvable:$true] %s17_s25 }
   0x4   :  { %s488_s26 = smov 64   ;;  %s489_s27 = smov 4  }
   0x5   :  { %38 = dma.hbm_to_vmem [thread:$0]  %s31_s20, 1024, %s33_s22, [#allocation6], %s488_s26, %s488_s26, %s489_s27  }
   0x6   :  { %s490_s28 = smov [#allocation2]   ;;  %s45_s1 = sshll.u32 %s556_s3, 4  ;;  %s46_s1 = int_to_ptr.hbm [resolvable:$true] %s45_s1 }
   0x7   :  { %s19_s29 = sshll.u32 %s490_s28, 4  ;;  %s491_s0 = smov [#allocation7]   ;;  %s20_s29 = int_to_ptr.vmem [resolvable:$true] %s19_s29 }
   0x8   :  { %25 = dma.hbm_to_vmem [thread:$0]  %s18_s25, 128, %s20_s29, [#allocation3], %s488_s26, %s488_s26, %s489_s27  }
   0x9   :  { %s47_s7 = sshll.u32 %s491_s0, 4  ;;  %s48_s7 = int_to_ptr.vmem [resolvable:$true] %s47_s7 }
   0xa   :  { %53 = dma.hbm_to_vmem [thread:$0]  %s46_s1, 1024, %s48_s7, [#allocation6], %s488_s26, %s488_s26, %s489_s27  }
   0xb   :  { %481 = dma.done.wait [#allocation3], 128  }
   0xc   :  { %482 = vsyncadd [#allocation3], 4294967168 }
   0xd   :  { %483 = dma.done.wait [#allocation6], 2048  }
   0xe   :  { %484 = vsyncadd [#allocation6], 4294965248  ;;  %v359_v0 = vld [vmem:[#allocation5 + $0x38] sm:$0xff]  ;;  %v358_v1 = vld [vmem:[#allocation5 + $0x30] sm:$0xff]  ;;  %s492_s10 = smov [#allocation8]   ;;  %s269_s14 = sshll.u32 %s558_s5, 4  ;;  %s270_s14 = int_to_ptr.hbm [resolvable:$true] %s269_s14 }
   0xf   :  { %144 = vmatpush.bf16.msra.mxu0 %v359_v0  ;;  %v357_v2 = vld [vmem:[#allocation5 + $0x28] sm:$0xff]  ;;  %v356_v3 = vld [vmem:[#allocation5 + $0x20] sm:$0xff]  ;;  %v355_v4 = vld [vmem:[#allocation5 + $0x18] sm:$0xff]  ;;  %s267_s11 = sshll.u32 %s492_s10, 4  ;;  %s268_s11 = int_to_ptr.vmem [resolvable:$true] %s267_s11 }
  0x10   :  { %v354_v5 = vld [vmem:[#allocation5 + $0x10] sm:$0xff]  ;;  %v353_v6 = vld [vmem:[#allocation5 + $0x8] sm:$0xff]  ;;  %v352_v7 = vld [vmem:[#allocation5] sm:$0xff] }
  0x11   :  { %v351_v8 = vld [vmem:[#allocation2] sm:$0xff]  ;;  %v366_v10 = vld [vmem:[#allocation7 + $0x30] sm:$0xff]  ;;  %v365_v11 = vld [vmem:[#allocation7 + $0x28] sm:$0xff] }
  0x12   :  { %v367_v9 = vld [vmem:[#allocation7 + $0x38] sm:$0xff]  ;;  %v364_v12 = vld [vmem:[#allocation7 + $0x20] sm:$0xff]  ;;  %v362_v14 = vld [vmem:[#allocation7 + $0x10] sm:$0xff] }
  0x13   :  { %145 = vmatpush.bf16.msra.mxu0 %v358_v1  ;;  %245 = vmatpush.bf16.msra.mxu1 %v367_v9  ;;  %v363_v13 = vld [vmem:[#allocation7 + $0x18] sm:$0xff]  ;;  %v361_v15 = vld [vmem:[#allocation7 + $0x8] sm:$0xff]  ;;  %v360_v16 = vld [vmem:[#allocation7] sm:$0xff] }
  0x14   :  { %v379_v17 = vld [vmem:[%s555_s2] ss:$0 sm:$0xff] }
  0x15   :  { %v380_v42 = vld [vmem:[%s557_s4] ss:$0 sm:$0xff] }
  0x17   :  { %146 = vmatpush.bf16.msra.mxu0 %v357_v2  ;;  %246 = vmatpush.bf16.msra.mxu1 %v366_v10 }
  0x1b   :  { %147 = vmatpush.bf16.msra.mxu0 %v356_v3  ;;  %247 = vmatpush.bf16.msra.mxu1 %v365_v11 }
  0x1f   :  { %148 = vmatpush.bf16.msra.mxu0 %v355_v4  ;;  %248 = vmatpush.bf16.msra.mxu1 %v364_v12 }
  0x23   :  { %149 = vmatpush.bf16.msra.mxu0 %v354_v5  ;;  %249 = vmatpush.bf16.msra.mxu1 %v363_v13 }
  0x27   :  { %150 = vmatpush.bf16.msra.mxu0 %v353_v6  ;;  %250 = vmatpush.bf16.msra.mxu1 %v362_v14 }
  0x2b   :  { %151 = vmatpush.bf16.msra.mxu0 %v352_v7  ;;  %251 = vmatpush.bf16.msra.mxu1 %v361_v15 }
  0x2e   :  { %152 = vmatmul.bf16.vlgmr.msra.gmra.mxu0 %v351_v8 }
  0x2f   :  { %252 = vmatpush.bf16.msra.mxu1 %v360_v16 }
  0xab   :  { %v153_v18 = vpop.f32.mrf.mxu0 }
  0xac   :  { %v154_v19 = vadd.f32 %v379_v17, %v153_v18 }
  0xae   :  { %v160_v20 = vmul.f32 %v154_v19, %v154_v19  ;;  %v158_v35 = vmul.f32 0.5, %v154_v19 }
  0xb0   :  { %v162_v21 = vmul.f32 %v160_v20, %v154_v19 }
  0xb2   :  { %v164_v22 = vmul.f32 0.044715, %v162_v21 }
  0xb3   :  { %v155_v23 = vpop.f32.mrf.mxu0 }
  0xb4   :  { %v156_v24 = vadd.f32 %v379_v17, %v155_v23  ;;  %v166_v25 = vadd.f32 %v164_v22, %v154_v19 }
  0xb6   :  { %v161_v26 = vmul.f32 %v156_v24, %v156_v24  ;;  %v168_v28 = vmul.f32 0.7978846, %v166_v25  ;;  %v159_v36 = vmul.f32 0.5, %v156_v24 }
  0xb8   :  { %v163_v27 = vmul.f32 %v161_v26, %v156_v24  ;;  %381 = vtanh.f32 %v168_v28 }
  0xba   :  { %v165_v29 = vmul.f32 0.044715, %v163_v27 }
  0xbc   :  { %v167_v30 = vadd.f32 %v165_v29, %v156_v24 }
  0xbe   :  { %v169_v31 = vmul.f32 0.7978846, %v167_v30  ;;  %v382_v32 = vpop.eup %381 }
  0xbf   :  { %v172_v33 = vadd.f32 1.0, %v382_v32 }
  0xc0   :  { %383 = vtanh.f32 %v169_v31 }
  0xc1   :  { %v174_v38 = vmul.f32 %v172_v33, %v158_v35 }
  0xc6   :  { %v384_v34 = vpop.eup %383 }
  0xc7   :  { %v173_v37 = vadd.f32 1.0, %v384_v34 }
  0xc9   :  { %v175_v39 = vmul.f32 %v173_v37, %v159_v36 }
  0xcb   :  { %v176_v40 = vpack.c.bf16 %v175_v39, %v174_v38 }
  0xcd   :  { %253 = vmatmul.bf16.vlgmr.msra.gmra.mxu1 %v176_v40 }
 0x14a   :  { %v254_v41 = vpop.f32.mrf.mxu1 }
 0x14b   :  { %v255_v44 = vadd.f32 %v380_v42, %v254_v41 }
 0x152   :  { %v256_v43 = vpop.f32.mrf.mxu1 }
 0x153   :  { %v257_v45 = vadd.f32 %v380_v42, %v256_v43 }
 0x155   :  { %v371_v46 = vpack.c.bf16 %v257_v45, %v255_v44 }
 0x157   :  { %372 = vst [vmem:[#allocation8] sm:$0xff] %v371_v46  }
 0x158   :  { %275 = dma.vmem_to_hbm [thread:$0]  %s268_s11, 128, %s270_s14, [#allocation4], %s488_s26, %s488_s26, %s489_s27  }
 0x159   :  { %485 = dma.done.wait [#allocation4], 128  }
 0x15a   :  { %486 = vsyncadd [#allocation4], 4294967168 }
 0x15b   :  { %280 = vsyncpa [#allocation3], 1 }
 0x15c   :  { %281 = vsyncpa [#allocation6], 1 }
 0x15d   :  { %282 = vsyncpa [#allocation4], 1 }

</bundles_post_ra>
